<compile_context>
chip_gen: v5e
topology: v5e:2x2
jax: 0.10.0
libtpu: 0.0.40
codegen_flags: <defaults>
</compile_context>

<pallas_src>
import jax
import jax.numpy as jnp
from jax.experimental import pallas as pl
from jax.experimental.pallas import tpu as pltpu

_LANE = 128
_SUBLANE = 8
# ~3 MiB of input per block -> (in + out) * double-buffer ~= 12 MiB of VMEM.
_TARGET_BLOCK_BYTES = 3 * 1024 * 1024


def _ycbcr_to_rgb_kernel(x_ref, o_ref):
    # Block is (tile_b, 3, rows, 128) on the lane-dense path or (tile_b, 3, T)
    # on the fallback path; the body is rank-agnostic (channel axis is axis 1).
    x = x_ref[...]
    y = x[:, 0:1]
    cb = x[:, 1:2] - 0.5
    cr = x[:, 2:3] - 0.5
    o_ref[:, 0:1] = (y + 1.403 * cr).astype(o_ref.dtype)
    o_ref[:, 1:2] = (y - 0.714 * cr - 0.344 * cb).astype(o_ref.dtype)
    o_ref[:, 2:3] = (y + 1.773 * cb).astype(o_ref.dtype)


def ycbcr_to_rgb(image: jax.Array) -> jax.Array:
    if image.ndim < 3 or image.shape[-3] != 3:
        raise ValueError(
            "Input size must have a shape of (*, 3, H, W). Got {}".format(image.shape)
        )
    orig_shape = image.shape
    dtype = image.dtype
    H, W = orig_shape[-2], orig_shape[-1]
    N = H * W
    B = 1
    for d in orig_shape[:-3]:
        B *= int(d)

    itemsize = jnp.dtype(dtype).itemsize
    target_elems = _TARGET_BLOCK_BYTES // itemsize          # elems per block (all 3 chans)
    target_per_chan = max(_LANE, target_elems // 3)          # elems per channel per block

    if N % _LANE == 0:
        # Lane-dense layout: per-channel tiles are (tile_r, 128).
        rows = N // _LANE
        x = image.reshape(B, 3, rows, _LANE)
        max_rows = max(_SUBLANE, ((target_per_chan // _LANE) // _SUBLANE) * _SUBLANE)
        if rows > max_rows:
            tile_r, tile_b = max_rows, 1
        else:
            tile_r = rows
            tile_b = max(1, min(B, target_per_chan // max(rows * _LANE, 1)))
        grid = (pl.cdiv(B, tile_b), pl.cdiv(rows, tile_r))
        block = (tile_b, 3, tile_r, _LANE)
        index_map = lambda b, r: (b, 0, r, 0)
        out_struct = jax.ShapeDtypeStruct((B, 3, rows, _LANE), dtype)
    else:
        # Fallback for H*W not a multiple of 128: keep flattened pixels on the
        # last (lane) axis; tile it in multiples of 128 (or take it whole).
        x = image.reshape(B, 3, N)
        max_n = max(_LANE, (target_per_chan // _LANE) * _LANE)
        if N > max_n:
            tile_n, tile_b = max_n, 1
        else:
            tile_n = N
            tile_b = max(1, min(B, target_per_chan // max(N, 1)))
        grid = (pl.cdiv(B, tile_b), pl.cdiv(N, tile_n))
        block = (tile_b, 3, tile_n)
        index_map = lambda b, t: (b, 0, t)
        out_struct = jax.ShapeDtypeStruct((B, 3, N), dtype)

    total_elems = B * 3 * N
    out = pl.pallas_call(
        _ycbcr_to_rgb_kernel,
        out_shape=out_struct,
        grid=grid,
        in_specs=[pl.BlockSpec(block, index_map)],
        out_specs=pl.BlockSpec(block, index_map),
        compiler_params=pltpu.CompilerParams(
            dimension_semantics=("parallel", "parallel"),
            vmem_limit_bytes=32 * 1024 * 1024,
        ),
        cost_estimate=pl.CostEstimate(
            flops=5 * total_elems,
            transcendentals=0,
            bytes_accessed=2 * total_elems * itemsize,
        ),
    )(x)
    return out.reshape(orig_shape)


class YcbcrToRgb:
    """Convert image from YCbCr to RGB (Pallas TPU kernel). Range assumed (0, 1)."""

    def __call__(self, image: jax.Array) -> jax.Array:
        return ycbcr_to_rgb(image)


def _reference(x: jax.Array) -> jax.Array:
    y = x[..., 0, :, :]
    cb = x[..., 1, :, :] - 0.5
    cr = x[..., 2, :, :] - 0.5
    return jnp.stack(
        (y + 1.403 * cr, y - 0.714 * cr - 0.344 * cb, y + 1.773 * cb), axis=-3
    )


if __name__ == "__main__":
    key = jax.random.PRNGKey(0)
    module = YcbcrToRgb()

    # Lane-dense path: H*W multiple of 128.
    x1 = jax.random.uniform(key, (2, 3, 16, 16), dtype=jnp.float32)
    out1 = jax.block_until_ready(module(x1))
    assert out1.shape == x1.shape and out1.dtype == x1.dtype
    assert jnp.max(jnp.abs(out1 - _reference(x1))) < 1e-5

    # Fallback path: H*W not a multiple of 128.
    x2 = jax.random.uniform(jax.random.PRNGKey(1), (2, 3, 5, 7), dtype=jnp.float32)
    out2 = jax.block_until_ready(module(x2))
    assert out2.shape == x2.shape and out2.dtype == x2.dtype
    assert jnp.max(jnp.abs(out2 - _reference(x2))) < 1e-5

    print("KERNEL_OK")
</pallas_src>

<mosaic_0001>
module attributes {stable_mosaic.version = 11 : i64} {
  func.func @_ycbcr_to_rgb_kernel(%arg0: i32, %arg1: i32, %arg2: memref<2x3x2x128xf32, #tpu.memory_space<vmem>>, %arg3: memref<2x3x2x128xf32, #tpu.memory_space<vmem>>) attributes {dimension_semantics = [#tpu.dimension_semantics<parallel>, #tpu.dimension_semantics<parallel>], iteration_bounds = array<i64: 1, 1>, scalar_prefetch = 0 : i64, scratch_operands = 0 : i64, tpu.core_type = #tpu.core_type<tc>, window_params = [{transform_indices = @transform_0, window_bounds = array<i64: 2, 3, 2, 128>}, {transform_indices = @transform_1, window_bounds = array<i64: 2, 3, 2, 128>}]} {
    %c0 = arith.constant 0 : index
    %c0_0 = arith.constant 0 : index
    %c0_1 = arith.constant 0 : index
    %c0_2 = arith.constant 0 : index
    %0 = vector.load %arg2[%c0, %c0_0, %c0_1, %c0_2] : memref<2x3x2x128xf32, #tpu.memory_space<vmem>>, vector<2x3x2x128xf32>
    %1 = vector.extract_strided_slice %0 {offsets = [0, 0, 0, 0], sizes = [2, 1, 2, 128], strides = [1, 1, 1, 1]} : vector<2x3x2x128xf32> to vector<2x1x2x128xf32>
    %2 = vector.extract_strided_slice %0 {offsets = [0, 1, 0, 0], sizes = [2, 1, 2, 128], strides = [1, 1, 1, 1]} : vector<2x3x2x128xf32> to vector<2x1x2x128xf32>
    %cst = arith.constant 5.000000e-01 : f32
    %3 = vector.broadcast %cst : f32 to vector<2x1x2x128xf32>
    %4 = arith.subf %2, %3 : vector<2x1x2x128xf32>
    %5 = vector.extract_strided_slice %0 {offsets = [0, 2, 0, 0], sizes = [2, 1, 2, 128], strides = [1, 1, 1, 1]} : vector<2x3x2x128xf32> to vector<2x1x2x128xf32>
    %cst_3 = arith.constant 5.000000e-01 : f32
    %6 = vector.broadcast %cst_3 : f32 to vector<2x1x2x128xf32>
    %7 = arith.subf %5, %6 : vector<2x1x2x128xf32>
    %cst_4 = arith.constant 1.403000e+00 : f32
    %8 = vector.broadcast %cst_4 : f32 to vector<2x1x2x128xf32>
    %9 = arith.mulf %8, %7 : vector<2x1x2x128xf32>
    %10 = arith.addf %1, %9 : vector<2x1x2x128xf32>
    %c0_5 = arith.constant 0 : index
    %c0_6 = arith.constant 0 : index
    %c0_7 = arith.constant 0 : index
    %c0_8 = arith.constant 0 : index
    %11 = vector.load %arg3[%c0_5, %c0_6, %c0_7, %c0_8] : memref<2x3x2x128xf32, #tpu.memory_space<vmem>>, vector<2x1x2x128xf32>
    tpu.vector_store %arg3[%c0_5, %c0_6, %c0_7, %c0_8], %10 {strides = array<i32>} : memref<2x3x2x128xf32, #tpu.memory_space<vmem>>, vector<2x1x2x128xf32>,
    %cst_9 = arith.constant 7.140000e-01 : f32
    %12 = vector.broadcast %cst_9 : f32 to vector<2x1x2x128xf32>
    %13 = arith.mulf %12, %7 : vector<2x1x2x128xf32>
    %14 = arith.subf %1, %13 : vector<2x1x2x128xf32>
    %cst_10 = arith.constant 3.440000e-01 : f32
    %15 = vector.broadcast %cst_10 : f32 to vector<2x1x2x128xf32>
    %16 = arith.mulf %15, %4 : vector<2x1x2x128xf32>
    %17 = arith.subf %14, %16 : vector<2x1x2x128xf32>
    %c0_11 = arith.constant 0 : index
    %c1 = arith.constant 1 : index
    %c0_12 = arith.constant 0 : index
    %c0_13 = arith.constant 0 : index
    %18 = vector.load %arg3[%c0_11, %c1, %c0_12, %c0_13] : memref<2x3x2x128xf32, #tpu.memory_space<vmem>>, vector<2x1x2x128xf32>
    tpu.vector_store %arg3[%c0_11, %c1, %c0_12, %c0_13], %17 {strides = array<i32>} : memref<2x3x2x128xf32, #tpu.memory_space<vmem>>, vector<2x1x2x128xf32>,
    %cst_14 = arith.constant 1.773000e+00 : f32
    %19 = vector.broadcast %cst_14 : f32 to vector<2x1x2x128xf32>
    %20 = arith.mulf %19, %4 : vector<2x1x2x128xf32>
    %21 = arith.addf %1, %20 : vector<2x1x2x128xf32>
    %c0_15 = arith.constant 0 : index
    %c2 = arith.constant 2 : index
    %c0_16 = arith.constant 0 : index
    %c0_17 = arith.constant 0 : index
    %22 = vector.load %arg3[%c0_15, %c2, %c0_16, %c0_17] : memref<2x3x2x128xf32, #tpu.memory_space<vmem>>, vector<2x1x2x128xf32>
    tpu.vector_store %arg3[%c0_15, %c2, %c0_16, %c0_17], %21 {strides = array<i32>} : memref<2x3x2x128xf32, #tpu.memory_space<vmem>>, vector<2x1x2x128xf32>,
    return
  }
  func.func @transform_0(%arg0: i32, %arg1: i32) -> (i32, i32, i32, i32) {
    %c0_i32 = arith.constant 0 : i32
    %c0_i32_0 = arith.constant 0 : i32
    %c0_i32_1 = arith.constant 0 : i32
    return %arg0, %c0_i32, %arg1, %c0_i32_0 : i32, i32, i32, i32
  }
  func.func @transform_1(%arg0: i32, %arg1: i32) -> (i32, i32, i32, i32) {
    %c0_i32 = arith.constant 0 : i32
    %c0_i32_0 = arith.constant 0 : i32
    %c0_i32_1 = arith.constant 0 : i32
    return %arg0, %c0_i32, %arg1, %c0_i32_0 : i32, i32, i32, i32
  }
}

</mosaic_0001>

<bundles_post_ra>
// kernel: tpu_custom_call.1
= control target key start
LH: loop header
LB: loop body
LE: loop exit
PB: predicated region body
PF: predicated region fallthrough
CT: control target
= control target key end

     0   :  { %6 = vsyncpa [#allocation3], 0  ;;  %s164_s0 = inlined_call_operand.hbm [shape: f32[2,3,2,128], index: 0, kind: input, shape index: {}]   ;;  %s165_s1 = inlined_call_operand.hbm [shape: f32[2,3,2,128], index: 1, kind: output, shape index: {}]  }
   0x1   :  { %7 = vsyncpa [#allocation4], 0  ;;  %s12_s8 = sshll.u32 %s164_s0, 4  ;;  %s138_s9 = smov [#allocation2]   ;;  %s13_s8 = int_to_ptr.hbm [resolvable:$true] %s12_s8 }
   0x2   :  { %s14_s10 = sshll.u32 %s138_s9, 4  ;;  %s139_s11 = smov 32   ;;  %s15_s10 = int_to_ptr.vmem [resolvable:$true] %s14_s10 }
   0x3   :  { %s140_s12 = smov 2  }
   0x4   :  { %20 = dma.hbm_to_vmem [thread:$0]  %s13_s8, 192, %s15_s10, [#allocation3], %s139_s11, %s139_s11, %s140_s12  }
   0x5   :  { %134 = dma.done.wait [#allocation3], 192  }
   0x6   :  { %135 = vsyncadd [#allocation3], 4294967104  ;;  %v25_v0 = vld [vmem:[#allocation2] sm:$0x3]  ;;  %v27_v1 = vld [vmem:[#allocation2 + $0x4] sm:$0x3] }
   0x7   :  { %v80_v2 = vadd.f32 -0.5, %v27_v1  ;;  %v30_v3 = vld [vmem:[#allocation2 + $0xa] sm:$0x3]  ;;  %v26_v4 = vld [vmem:[#allocation2 + $0x2] sm:$0x3]  ;;  %s141_s0 = smov [#allocation5]  }
   0x8   :  { %v28_v5 = vld [vmem:[#allocation2 + $0x6] sm:$0x3]  ;;  %v81_v6 = vadd.f32 -0.5, %v30_v3  ;;  %v78_v7 = vadd.f32 -0.5, %v26_v4  ;;  %v29_v8 = vld [vmem:[#allocation2 + $0x8] sm:$0x3] }
   0x9   :  { %v35_v9 = vmul.f32 1.403, %v80_v2  ;;  %v41_v10 = vmul.f32 0.714, %v80_v2  ;;  %v79_v11 = vadd.f32 -0.5, %v29_v8  ;;  %s63_s13 = sshll.u32 %s141_s0, 4  ;;  %s64_s13 = int_to_ptr.vmem [resolvable:$true] %s63_s13 }
   0xa   :  { %v36_v12 = vmul.f32 1.403, %v81_v6  ;;  %v45_v13 = vmul.f32 0.344, %v78_v7  ;;  %v42_v14 = vmul.f32 0.714, %v81_v6 }
   0xb   :  { %v37_v15 = vadd.f32 %v35_v9, %v25_v0  ;;  %v43_v16 = vsub.f32 %v25_v0, %v41_v10  ;;  %v46_v17 = vmul.f32 0.344, %v79_v11  ;;  %v52_v18 = vmul.f32 1.773, %v78_v7  ;;  %s65_s16 = sshll.u32 %s165_s1, 4  ;;  %s66_s16 = int_to_ptr.hbm [resolvable:$true] %s65_s16 }
   0xc   :  { %v38_v19 = vadd.f32 %v36_v12, %v28_v5  ;;  %v44_v20 = vsub.f32 %v28_v5, %v42_v14  ;;  %v53_v21 = vmul.f32 1.773, %v79_v11 }
   0xd   :  { %39 = vst [vmem:[#allocation5] sm:$0x3] %v37_v15  ;;  %v47_v22 = vsub.f32 %v43_v16, %v45_v13  ;;  %v54_v23 = vadd.f32 %v52_v18, %v25_v0 }
   0xe   :  { %40 = vst [vmem:[#allocation5 + $0x6] sm:$0x3] %v38_v19  ;;  %v48_v24 = vsub.f32 %v44_v20, %v46_v17  ;;  %v55_v25 = vadd.f32 %v53_v21, %v28_v5 }
   0xf   :  { %50 = vst [vmem:[#allocation5 + $0x2] sm:$0x3] %v47_v22 }
  0x10   :  { %51 = vst [vmem:[#allocation5 + $0x8] sm:$0x3] %v48_v24 }
  0x11   :  { %57 = vst [vmem:[#allocation5 + $0x4] sm:$0x3] %v54_v23 }
  0x12   :  { %58 = vst [vmem:[#allocation5 + $0xa] sm:$0x3] %v55_v25 }
  0x13   :  { %71 = dma.vmem_to_hbm [thread:$0]  %s64_s13, 192, %s66_s16, [#allocation4], %s139_s11, %s139_s11, %s140_s12  }
  0x14   :  { %136 = dma.done.wait [#allocation4], 192  }
  0x15   :  { %137 = vsyncadd [#allocation4], 4294967104 }
  0x16   :  { %76 = vsyncpa [#allocation3], 1 }
  0x17   :  { %77 = vsyncpa [#allocation4], 1 }

</bundles_post_ra>
